<compile_context>
chip_gen: v7x
topology: tpu7x:2x2x1
jax: 0.10.0
libtpu: 0.0.40
codegen_flags: <defaults>
</compile_context>

<pallas_src>
import jax
import jax.numpy as jnp
from jax.experimental import pallas as pl
from jax.experimental.pallas import tpu as pltpu


def attention_kernel(x_ref, w_ref, b_ref, ctx_ref, wts_ref):
    # x_ref : (BT, T, H) block of batch rows (VMEM), input dtype
    # w_ref : (1, H)     attention projection weight row (VMEM, lane-dense), input dtype
    # b_ref : (1, 1)     attention projection bias (SMEM, f32 scalar)
    in_dt = x_ref.dtype
    w = w_ref[...]                                           # (1, H)
    b = b_ref[0, 0]                                          # f32 scalar

    # --- Phase 1: scores = Linear(H->1)(x) in (BT, T) layout --------------------------------
    # Multiply in the input dtype (packed bf16 on v6e/v7x), accumulate the lane reduce in f32.
    prod_s = (x_ref[...] * w).astype(jnp.float32)            # (BT, T, H) f32, phase-local temp
    scores = jnp.sum(prod_s, axis=-1) + b                    # (BT, T) f32

    # --- Numerically-stable softmax over the sequence (lane) axis ---------------------------
    m = jnp.max(scores, axis=-1, keepdims=True)              # (BT, 1)
    p = jnp.exp(scores - m)                                  # (BT, T)
    denom = jnp.sum(p, axis=-1, keepdims=True)               # (BT, 1)

    # EUP approximate reciprocal (its own VLIW slot) + one Newton step -> ~f32 accuracy.
    inv = pl.reciprocal(denom, approx=True)
    inv = inv * (2.0 - denom * inv)
    wts = p * inv                                            # (BT, T) f32

    # --- Phase 2: context = sum_t x[:, t, :] * wts[:, t] -------------------------------------
    # Re-read x_ref (no full-block f32 copy kept live across the softmax); multiply in the
    # input dtype, accumulate the sublane reduce over T in f32.
    wts_in = wts.astype(in_dt)                               # (BT, T)
    prod_c = (x_ref[...] * wts_in[..., None]).astype(jnp.float32)  # (BT, T, H) phase-local temp
    ctx = jnp.sum(prod_c, axis=1)                            # (BT, H) f32

    ctx_ref[...] = ctx.astype(ctx_ref.dtype)
    wts_ref[...] = wts.astype(wts_ref.dtype)                 # sublane/lane-dense stores


def _round_up(x, m):
    return ((x + m - 1) // m) * m


def _pick_block_and_vmem(B, T, H, itemsize):
    """Choose the batch block size bt (multiple of 8) and an explicit VMEM limit."""
    # Per-generation VMEM budget (leave headroom below physical capacity; v7x has 64 MiB).
    try:
        phys = int(pltpu.get_tpu_info().vmem_capacity_bytes)
    except Exception:
        phys = 64 << 20                                      # conservative (v7x) fallback
    budget = max(16 << 20, min(phys - (16 << 20), 96 << 20))

    row_bytes = T * H * itemsize                             # one batch row of x
    # Per-batch-row VMEM footprint: double-buffered x tile + one phase-local f32 temp
    # + double-buffered (T + H) outputs (>= f32 sized to be safe).
    per_bt = 2 * row_bytes + T * H * 4 + 2 * (T + H) * max(itemsize, 4)
    margin = 2 << 20

    # Target ~2 MiB x tile (measured ~85% of HBM roofline), rounded to a multiple of 8.
    bt = max(8, ((2 << 20) // max(row_bytes, 1)) // 8 * 8)
    # Cap by the VMEM budget.
    bt_max = max(8, ((budget - margin) // max(per_bt, 1)) // 8 * 8)
    bt = min(bt, bt_max)
    # No point in a block larger than the (padded) batch.
    bt = min(bt, _round_up(B, 8))
    # Guarantee >= 2 grid steps when the batch allows it (v7x: feed both TensorCores).
    if B > 8:
        half = _round_up(-(-B // 2), 8)                      # ceil(B/2), rounded up to 8
        bt = min(bt, max(8, half))
    bt = max(8, bt)

    vmem_need = bt * per_bt + margin
    vmem_limit = int(min(budget, max(vmem_need, 16 << 20)))
    return bt, vmem_limit


def attention_forward(lstm_output, attn_weight, attn_bias, *, block_b=None):
    """lstm_output: (B, T, H); attn_weight: (1, H) (PyTorch Linear layout); attn_bias: (1,)."""
    B, T, H = lstm_output.shape
    out_dtype = lstm_output.dtype
    itemsize = jnp.dtype(out_dtype).itemsize

    bt, vmem_limit = _pick_block_and_vmem(B, T, H, itemsize)
    if block_b is not None:
        bt = max(8, _round_up(int(block_b), 8))

    b_pad = pl.cdiv(B, bt) * bt
    if b_pad != B:
        # Pad the batch tail; padded rows are computed (harmlessly) and sliced off below.
        lstm_output = jnp.pad(lstm_output, ((0, b_pad - B), (0, 0), (0, 0)))

    # Weight row in the input dtype (bf16 math on v6e/v7x when the input is bf16);
    # bias stays an f32 scalar in SMEM and is added after the f32 accumulation.
    w = attn_weight.reshape(1, H).astype(out_dtype)
    b = attn_bias.reshape(1, 1).astype(jnp.float32)

    cost = pl.CostEstimate(
        flops=4 * b_pad * T * H + 4 * b_pad * T,
        transcendentals=b_pad * T,
        bytes_accessed=(b_pad * T * H * itemsize                 # x
                        + b_pad * (T + H) * itemsize             # outputs
                        + (b_pad // bt) * (H * itemsize + 4)),   # weight row + bias per step
    )

    ctx, wts = pl.pallas_call(
        attention_kernel,
        out_shape=(
            jax.ShapeDtypeStruct((b_pad, H), out_dtype),
            jax.ShapeDtypeStruct((b_pad, T), out_dtype),
        ),
        grid_spec=pltpu.PrefetchScalarGridSpec(
            num_scalar_prefetch=0,
            grid=(b_pad // bt,),
            in_specs=[
                pl.BlockSpec((bt, T, H), lambda i: (i, 0, 0)),      # batched x tile
                pl.BlockSpec((1, H), lambda i: (0, 0)),             # shared weight row
                pl.BlockSpec(memory_space=pltpu.MemorySpace.SMEM),  # bias scalar in SMEM
            ],
            out_specs=[
                pl.BlockSpec((bt, H), lambda i: (i, 0)),
                pl.BlockSpec((bt, T), lambda i: (i, 0)),
            ],
        ),
        compiler_params=pltpu.CompilerParams(
            dimension_semantics=("parallel",),   # batch blocks shard across TCs on v7x
            vmem_limit_bytes=vmem_limit,
        ),
        cost_estimate=cost,
    )(lstm_output, w, b)

    return ctx[:B], wts[:B]


def attention_reference(lstm_output, attn_weight, attn_bias):
    # Pure-JAX reference mirroring the PyTorch forward exactly.
    scores = jnp.einsum("bth,oh->bto", lstm_output, attn_weight) + attn_bias  # (B, T, 1)
    scores = scores[..., 0]                                                   # (B, T)
    wts = jax.nn.softmax(scores, axis=1)
    ctx = jnp.sum(lstm_output * wts[..., None], axis=1)
    return ctx, wts


if __name__ == "__main__":
    B, T, H = 2, 8, 32
    key = jax.random.PRNGKey(0)
    k_x, k_w, k_b = jax.random.split(key, 3)

    lstm_output = jax.random.normal(k_x, (B, T, H), dtype=jnp.float32)
    # Deterministic "Linear(hidden_size, 1)" params: weight (1, H), bias (1,)
    bound = 1.0 / (H ** 0.5)
    attn_weight = jax.random.uniform(k_w, (1, H), minval=-bound, maxval=bound, dtype=jnp.float32)
    attn_bias = jax.random.uniform(k_b, (1,), minval=-bound, maxval=bound, dtype=jnp.float32)

    ctx, wts = attention_forward(lstm_output, attn_weight, attn_bias)
    jax.block_until_ready((ctx, wts))

    ctx_ref, wts_ref = attention_reference(lstm_output, attn_weight, attn_bias)
    assert ctx.shape == (B, H) and wts.shape == (B, T)
    # Tolerance accounts for the EUP approximate reciprocal (+1 Newton step => ~f32 accuracy).
    assert jnp.allclose(ctx, ctx_ref, atol=1e-4, rtol=1e-4)
    assert jnp.allclose(wts, wts_ref, atol=1e-4, rtol=1e-4)

    print("KERNEL_OK")
</pallas_src>

<mosaic_0001>
module attributes {stable_mosaic.version = 11 : i64} {
  func.func @attention_kernel(%arg0: i32, %arg1: memref<8x8x32xf32, #tpu.memory_space<vmem>>, %arg2: memref<1x32xf32, #tpu.memory_space<vmem>>, %arg3: memref<1x1xf32, #tpu.memory_space<smem>>, %arg4: memref<8x32xf32, #tpu.memory_space<vmem>>, %arg5: memref<8x8xf32, #tpu.memory_space<vmem>>) attributes {dimension_semantics = [#tpu.dimension_semantics<parallel>], iteration_bounds = array<i64: 1>, scalar_prefetch = 0 : i64, scratch_operands = 0 : i64, tpu.core_type = #tpu.core_type<tc>, window_params = [{transform_indices = @transform_0, window_bounds = array<i64: 8, 8, 32>}, {pipeline_mode = #tpu.pipeline_mode<synchronous>, transform_indices = @transform_1, window_bounds = array<i64: 1, 32>}, {transform_indices = @transform_2, window_bounds = array<i64: 1, 1>}, {transform_indices = @transform_3, window_bounds = array<i64: 8, 32>}, {transform_indices = @transform_4, window_bounds = array<i64: 8, 8>}]} {
    %c0 = arith.constant 0 : index
    %c0_0 = arith.constant 0 : index
    %0 = vector.load %arg2[%c0, %c0_0] : memref<1x32xf32, #tpu.memory_space<vmem>>, vector<1x32xf32>
    %c0_1 = arith.constant 0 : index
    %c0_2 = arith.constant 0 : index
    %1 = memref.load %arg3[%c0_1, %c0_2] : memref<1x1xf32, #tpu.memory_space<smem>>
    %c0_3 = arith.constant 0 : index
    %c0_4 = arith.constant 0 : index
    %c0_5 = arith.constant 0 : index
    %2 = vector.load %arg1[%c0_3, %c0_4, %c0_5] : memref<8x8x32xf32, #tpu.memory_space<vmem>>, vector<8x8x32xf32>
    %3 = vector.shape_cast %0 : vector<1x32xf32> to vector<1x1x32xf32>
    %4 = vector.broadcast %3 : vector<1x1x32xf32> to vector<8x8x32xf32>
    %5 = arith.mulf %2, %4 : vector<8x8x32xf32>
    %cst = arith.constant dense<0.000000e+00> : vector<8x8xf32>
    %6 = vector.multi_reduction <add>, %5, %cst [2] : vector<8x8x32xf32> to vector<8x8xf32>
    %7 = vector.broadcast %1 : f32 to vector<8x8xf32>
    %8 = arith.addf %6, %7 : vector<8x8xf32>
    %cst_6 = arith.constant dense<0xFF800000> : vector<8xf32>
    %9 = vector.multi_reduction <maximumf>, %8, %cst_6 [1] : vector<8x8xf32> to vector<8xf32>
    %10 = vector.shape_cast %9 : vector<8xf32> to vector<8x1xf32>
    %11 = vector.broadcast %10 : vector<8x1xf32> to vector<8x8xf32>
    %12 = arith.subf %8, %11 : vector<8x8xf32>
    %13 = math.exp %12 : vector<8x8xf32>
    %cst_7 = arith.constant dense<0.000000e+00> : vector<8xf32>
    %14 = vector.multi_reduction <add>, %13, %cst_7 [1] : vector<8x8xf32> to vector<8xf32>
    %15 = vector.shape_cast %14 : vector<8xf32> to vector<8x1xf32>
    %16 = tpu.reciprocal %15 {approx = true} : vector<8x1xf32> -> vector<8x1xf32>
    %17 = arith.mulf %15, %16 : vector<8x1xf32>
    %cst_8 = arith.constant 2.000000e+00 : f32
    %18 = vector.broadcast %cst_8 : f32 to vector<8x1xf32>
    %19 = arith.subf %18, %17 : vector<8x1xf32>
    %20 = arith.mulf %16, %19 : vector<8x1xf32>
    %21 = vector.broadcast %20 : vector<8x1xf32> to vector<8x8xf32>
    %22 = arith.mulf %13, %21 : vector<8x8xf32>
    %c0_9 = arith.constant 0 : index
    %c0_10 = arith.constant 0 : index
    %c0_11 = arith.constant 0 : index
    %23 = vector.load %arg1[%c0_9, %c0_10, %c0_11] : memref<8x8x32xf32, #tpu.memory_space<vmem>>, vector<8x8x32xf32>
    %24 = vector.shape_cast %22 : vector<8x8xf32> to vector<8x8x1xf32>
    %25 = vector.broadcast %24 : vector<8x8x1xf32> to vector<8x8x32xf32>
    %26 = arith.mulf %23, %25 : vector<8x8x32xf32>
    %cst_12 = arith.constant dense<0.000000e+00> : vector<8x32xf32>
    %27 = vector.multi_reduction <add>, %26, %cst_12 [1] : vector<8x8x32xf32> to vector<8x32xf32>
    %c0_13 = arith.constant 0 : index
    %c0_14 = arith.constant 0 : index
    %28 = vector.load %arg4[%c0_13, %c0_14] : memref<8x32xf32, #tpu.memory_space<vmem>>, vector<8x32xf32>
    tpu.vector_store %arg4[%c0_13, %c0_14], %27 {strides = array<i32>} : memref<8x32xf32, #tpu.memory_space<vmem>>, vector<8x32xf32>,
    %c0_15 = arith.constant 0 : index
    %c0_16 = arith.constant 0 : index
    %29 = vector.load %arg5[%c0_15, %c0_16] : memref<8x8xf32, #tpu.memory_space<vmem>>, vector<8x8xf32>
    tpu.vector_store %arg5[%c0_15, %c0_16], %22 {strides = array<i32>} : memref<8x8xf32, #tpu.memory_space<vmem>>, vector<8x8xf32>,
    return
  }
  func.func @transform_0(%arg0: i32) -> (i32, i32, i32) {
    %c0_i32 = arith.constant 0 : i32
    %c0_i32_0 = arith.constant 0 : i32
    %c0_i32_1 = arith.constant 0 : i32
    return %arg0, %c0_i32, %c0_i32_0 : i32, i32, i32
  }
  func.func @transform_1(%arg0: i32) -> (i32, i32) {
    %c0_i32 = arith.constant 0 : i32
    %c0_i32_0 = arith.constant 0 : i32
    %c0_i32_1 = arith.constant 0 : i32
    return %c0_i32, %c0_i32_0 : i32, i32
  }
  func.func @transform_2(%arg0: i32) -> (i32, i32) {
    %c0_i32 = arith.constant 0 : i32
    %c0_i32_0 = arith.constant 0 : i32
    %c0_i32_1 = arith.constant 0 : i32
    return %c0_i32, %c0_i32_0 : i32, i32
  }
  func.func @transform_3(%arg0: i32) -> (i32, i32) {
    %c0_i32 = arith.constant 0 : i32
    %c0_i32_0 = arith.constant 0 : i32
    return %arg0, %c0_i32 : i32, i32
  }
  func.func @transform_4(%arg0: i32) -> (i32, i32) {
    %c0_i32 = arith.constant 0 : i32
    %c0_i32_0 = arith.constant 0 : i32
    return %arg0, %c0_i32 : i32, i32
  }
}

</mosaic_0001>

<bundles_post_ra>
// kernel: tpu_custom_call.1
= control target key start
LH: loop header
LB: loop body
LE: loop exit
PB: predicated region body
PF: predicated region fallthrough
CT: control target
= control target key end

     0   :  { %11 = vsyncpa [#allocation4], 0  ;;  %s857_s0 = inlined_call_operand.hbm [shape: f32[8,8,32], index: 0, kind: input, shape index: {}]   ;;  %s858_s1 = inlined_call_operand.vmem [shape: f32[1,32], index: 1, kind: input, shape index: {}]   ;;  %s859_s2 = inlined_call_operand.<no memory space> [shape: f32[1,1], index: 2, kind: input, shape index: {}]   ;;  %s860_s3 = inlined_call_operand.hbm [shape: f32[8,32], index: 3, kind: output, shape index: {0}]   ;;  %s861_s4 = inlined_call_operand.hbm [shape: f32[8,8], index: 4, kind: output, shape index: {1}]  }
   0x1   :  { %12 = vsyncpa [#allocation5], 0 }
   0x2   :  { %13 = vsyncpa [#allocation8], 0  ;;  %s635_s15 = smov [#allocation3]   ;;  %s563_s19 = scalar_lea.hbm %s857_s0, 1024 }
   0x3   :  { %s19_s16 = sshll.u32 %s635_s15, 4  ;;  %p564_p0 = scmp.ne.s32.totalorder %s857_s0, %s563_s19  ;;  %s20_s16 = int_to_ptr.vmem [resolvable:$true] %s19_s16 }
   0x4   :  { %p567_p1 = scmp.lt.u32.totalorder %s563_s19, %s857_s0 }
   0x6   :  { %p569_p2 = pnand %p567_p1, %p564_p0 }
   0x8   :  { %572 = shalt.err (!%p569_p2)
}
   0x9   :  { %s573_s24 = scalar_lea.vmem %s20_s16, 1024  ;;  %p578_p4 = scmp.lt.s32.totalorder %s20_s16, %s20_s16 }
   0xa   :  { %p574_p3 = scmp.ne.s32.totalorder %s20_s16, %s573_s24  ;;  %p579_p5 = scmp.lt.s32.totalorder %s573_s24, %s573_s24 }
   0xc   :  { %p580_p6 = por %p579_p5, %p578_p4 }
   0xe   :  { %p581_p7 = pnand %p580_p6, %p574_p3 }
  0x10   :  { %584 = shalt.err (!%p581_p7)
}
  0x11   :  { %s636_s25 = smov 128   ;;  %s637_s26 = smov 8  }
  0x12   :  { %25 = dma.hbm_to_vmem [thread:$0]  %s857_s0, 1024, %s20_s16, [#allocation4], %s636_s25, %s636_s25, %s637_s26  }
  0x13   :  { %629 = dma.done.wait [#allocation4], 1024  }
  0x14   :  { %630 = vsyncadd [#allocation4], 4294966272  ;;  %v536_v0 = vld [vmem:[%s858_s1] ss:$0 sm:$0xff]  ;;  %vm57_vm0 = vcmask 261120   ;;  %v683_v2 = vld [vmem:[#allocation3 + $0x10] sm:$0xff]  ;;  %v99_v25 = vlaneseq  ;;  %v82_v28 = vstv %s859_s2 }
  0x15   :  { %v681_v1 = vld [vmem:[#allocation3] sm:$0xff]  ;;  %v51_v4 = vmul.f32 %v536_v0, %v683_v2  ;;  %v687_v5 = vld [vmem:[#allocation3 + $0x8] sm:$0xff]  ;;  %v689_v6 = vld [vmem:[#allocation3 + $0x18] sm:$0xff]  ;;  %vm133_vm1 = vcmask 1041409   ;;  %vm135_vm2 = vcmask 1042434   ;;  %vm137_vm3 = vcmask 1043459  }
  0x16   :  { %v49_v3 = vmul.f32 %v536_v0, %v681_v1  ;;  %v50_v7 = vmul.f32 %v536_v0, %v687_v5  ;;  %v52_v8 = vmul.f32 %v536_v0, %v689_v6  ;;  %v693_v9 = vld [vmem:[#allocation3 + $0x20] sm:$0xff]  ;;  %v695_v10 = vld [vmem:[#allocation3 + $0x28] sm:$0xff]  ;;  %v703_v17 = vld [vmem:[#allocation3 + $0x30] sm:$0xff]  ;;  %v100_v26 = vand.u32 127, %v99_v25  ;;  %s639_s2 = smov [#allocation7]  }
  0x17   :  { %v64_v12 = vsel %vm57_vm0, %v51_v4, 0.0  ;;  %v53_v15 = vmul.f32 %v536_v0, %v693_v9  ;;  %v54_v16 = vmul.f32 %v536_v0, %v695_v10  ;;  %v705_v18 = vld [vmem:[#allocation3 + $0x38] sm:$0xff]  ;;  %v55_v21 = vmul.f32 %v536_v0, %v703_v17  ;;  %s523_s5 = sshll.u32 %s639_s2, 4  ;;  %s524_s5 = int_to_ptr.vmem [resolvable:$true] %s523_s5 }
  0x18   :  { %v58_v11 = vsel %vm57_vm0, %v49_v3, 0.0  ;;  %65 = vadd.xlane.f32.xlu1 %v64_v12  ;;  %v61_v13 = vsel %vm57_vm0, %v50_v7, 0.0  ;;  %v67_v14 = vsel %vm57_vm0, %v52_v8, 0.0  ;;  %v56_v22 = vmul.f32 %v536_v0, %v705_v18  ;;  %s585_s6 = scalar_lea.vmem %s524_s5, 128  ;;  %p590_p9 = scmp.lt.s32.totalorder %s524_s5, %s524_s5 }
  0x19   :  { %59 = vadd.xlane.f32.xlu0 %v58_v11  ;;  %v70_v19 = vsel %vm57_vm0, %v53_v15, 0.0  ;;  %v73_v20 = vsel %vm57_vm0, %v54_v16, 0.0  ;;  %v76_v23 = vsel %vm57_vm0, %v55_v21, 0.0  ;;  %v713_v27 = vshrl.u32 %v99_v25, 7  ;;  %p586_p8 = scmp.ne.s32.totalorder %s524_s5, %s585_s6  ;;  %p591_p10 = scmp.lt.s32.totalorder %s585_s6, %s585_s6 }
  0x1a   :  { %v79_v24 = vsel %vm57_vm0, %v56_v22, 0.0  ;;  %vm139_vm4 = vcmask 1044484   ;;  %vm141_vm5 = vcmask 1045509   ;;  %vm143_vm6 = vcmask 1046534  }
  0x1b   :  { %v719_v31 = vsub.s32 %v100_v26, %v713_v27  ;;  %vm145_vm7 = vcmask 1047559   ;;  %vm148_vm8 = vcmask 64512   ;;  %v638_v62 = vmov 0   ;;  %p592_p11 = por %p591_p10, %p590_p9 }
  0x1c   :  { %68 = vadd.xlane.f32.xlu1 %v67_v14  ;;  %544 = vset.pattern.permute.xlu0 %v638_v62  ;;  %v155_v63 = vsub.s32 0, %v713_v27  ;;  %v159_v0 = vsub.s32 1, %v713_v27  ;;  %v163_v3 = vsub.s32 2, %v713_v27  ;;  %v167_v4 = vsub.s32 3, %v713_v27 }
  0x1d   :  { %62 = vadd.xlane.f32.xlu0 %v61_v13  ;;  %543 = vset.pattern.permute.xlu1 %v638_v62  ;;  %v171_v13 = vsub.s32 4, %v713_v27  ;;  %v175_v22 = vsub.s32 5, %v713_v27  ;;  %v179_v26 = vsub.s32 6, %v713_v27  ;;  %p593_p12 = pnand %p592_p11, %p586_p8 }
  0x20   :  { %74 = vadd.xlane.f32.xlu1 %v73_v20 }
  0x21   :  { %71 = vadd.xlane.f32.xlu0 %v70_v19 }
  0x24   :  { %80 = vadd.xlane.f32.xlu1 %v79_v24 }
  0x25   :  { %77 = vadd.xlane.f32.xlu0 %v76_v23 }
  0xa5   :  { %v66_v30 = vpop.xlane.xlu1 %65 }
  0xa6   :  { %v60_v29 = vpop.xlane.xlu0 %59  ;;  %v85_v33 = vadd.f32 %v82_v28, %v66_v30 }
  0xa7   :  { %v83_v32 = vadd.f32 %v82_v28, %v60_v29 }
  0xa8   :  { %v112_v41 = vrot.slane %v85_v33, %v719_v31 }
  0xa9   :  { %v69_v35 = vpop.xlane.xlu1 %68  ;;  %v104_v38 = vrot.slane %v83_v32, %v719_v31 }
  0xaa   :  { %v63_v34 = vpop.xlane.xlu0 %62  ;;  %v86_v37 = vadd.f32 %v82_v28, %v69_v35 }
  0xab   :  { %v84_v36 = vadd.f32 %v82_v28, %v63_v34 }
  0xac   :  { %v116_v40 = vrot.slane %v86_v37, %v719_v31 }
  0xad   :  { %v108_v39 = vrot.slane %v84_v36, %v719_v31  ;;  %v75_v43 = vpop.xlane.xlu1 %74 }
  0xae   :  { %v72_v42 = vpop.xlane.xlu0 %71  ;;  %v88_v46 = vadd.f32 %v82_v28, %v75_v43 }
  0xaf   :  { %v134_v44 = vsel %vm133_vm1, %v108_v39, %v104_v38  ;;  %v87_v45 = vadd.f32 %v82_v28, %v72_v42 }
  0xb0   :  { %v136_v47 = vsel %vm135_vm2, %v112_v41, %v134_v44  ;;  %v124_v50 = vrot.slane %v88_v46, %v719_v31 }
  0xb1   :  { %v138_v48 = vsel %vm137_vm3, %v116_v40, %v136_v47  ;;  %v120_v49 = vrot.slane %v87_v45, %v719_v31  ;;  %v81_v52 = vpop.xlane.xlu1 %80 }
  0xb2   :  { %v78_v51 = vpop.xlane.xlu0 %77  ;;  %v90_v55 = vadd.f32 %v82_v28, %v81_v52 }
  0xb3   :  { %v140_v53 = vsel %vm139_vm4, %v120_v49, %v138_v48  ;;  %v89_v54 = vadd.f32 %v82_v28, %v78_v51 }
  0xb4   :  { %v132_v57 = vrot.slane %v90_v55, %v719_v31  ;;  %v142_v58 = vsel %vm141_vm5, %v124_v50, %v140_v53 }
  0xb5   :  { %v128_v56 = vrot.slane %v89_v54, %v719_v31 }
  0xb7   :  { %v144_v59 = vsel %vm143_vm6, %v128_v56, %v142_v58 }
  0xb8   :  { %v146_v60 = vsel %vm145_vm7, %v132_v57, %v144_v59 }
  0xb9   :  { %v149_v61 = vsel %vm148_vm8, %v146_v60, -inf }
  0xba   :  { %150 = vmax.xlane.f32.xlu0 %v149_v61 }
 0x147   :  { %v151_v7 = vpop.xlane.xlu0 %150 }
 0x148   :  { %v156_v8 = vrot.slane %v151_v7, %v155_v63  ;;  %v160_v11 = vrot.slane %v151_v7, %v159_v0  ;;  %v164_v12 = vrot.slane %v151_v7, %v163_v3  ;;  %v168_v14 = vrot.slane %v151_v7, %v167_v4 }
 0x149   :  { %v172_v23 = vrot.slane %v151_v7, %v171_v13  ;;  %v176_v28 = vrot.slane %v151_v7, %v175_v22 }
 0x14a   :  { %v193_v15 = vsub.f32 %v83_v32, %v156_v8  ;;  %v194_v16 = vsub.f32 %v84_v36, %v160_v11  ;;  %v195_v19 = vsub.f32 %v85_v33, %v164_v12  ;;  %v196_v24 = vsub.f32 %v86_v37, %v168_v14 }
 0x14b   :  { %v197_v29 = vsub.f32 %v87_v45, %v172_v23  ;;  %v183_v32 = vsub.s32 7, %v713_v27  ;;  %v180_v33 = vrot.slane %v151_v7, %v179_v26  ;;  %v198_v34 = vsub.f32 %v88_v46, %v176_v28 }
 0x14c   :  { %v201_v20 = vmul.f32 1.442695, %v193_v15  ;;  %v203_v21 = vmul.f32 1.442695, %v194_v16  ;;  %v205_v25 = vmul.f32 1.442695, %v195_v19 }
 0x14d   :  { %v207_v30 = vmul.f32 1.442695, %v196_v24  ;;  %v209_v35 = vmul.f32 1.442695, %v197_v29  ;;  %v184_v38 = vrot.slane %v151_v7, %v183_v32  ;;  %v199_v39 = vsub.f32 %v89_v54, %v180_v33 }
 0x14e   :  { %545 = vpow2.f32 %v201_v20  ;;  %v211_v40 = vmul.f32 1.442695, %v198_v34 }
 0x14f   :  { %547 = vpow2.f32 %v203_v21  ;;  %v200_v42 = vsub.f32 %v90_v55, %v184_v38  ;;  %v213_v43 = vmul.f32 1.442695, %v199_v39 }
 0x150   :  { %549 = vpow2.f32 %v205_v25 }
 0x151   :  { %551 = vpow2.f32 %v207_v30  ;;  %v215_v45 = vmul.f32 1.442695, %v200_v42 }
 0x152   :  { %553 = vpow2.f32 %v209_v35 }
 0x153   :  { %555 = vpow2.f32 %v211_v40 }
 0x154   :  { %557 = vpow2.f32 %v213_v43 }
 0x155   :  { %559 = vpow2.f32 %v215_v45 }
 0x158   :  { %v546_v36 = vpop.eup %545 }
 0x159   :  { %v548_v37 = vpop.eup %547  ;;  %226 = vperm.xlu1 %543, %v546_v36  }
 0x15a   :  { %229 = vperm.xlu0 %544, %v548_v37   ;;  %v550_v41 = vpop.eup %549 }
 0x15b   :  { %v552_v44 = vpop.eup %551 }
 0x15c   :  { %v554_v46 = vpop.eup %553 }
 0x15d   :  { %232 = vperm.xlu1 %543, %v550_v41   ;;  %v556_v47 = vpop.eup %555 }
 0x15e   :  { %v558_v48 = vpop.eup %557 }
 0x15f   :  { %v560_v49 = vpop.eup %559 }
 0x161   :  { %235 = vperm.xlu1 %543, %v552_v44  }
 0x165   :  { %238 = vperm.xlu1 %543, %v554_v46  }
 0x169   :  { %241 = vperm.xlu1 %543, %v556_v47  }
 0x16d   :  { %244 = vperm.xlu1 %543, %v558_v48  }
 0x171   :  { %247 = vperm.xlu1 %543, %v560_v49  }
 0x1d8   :  { %v227_v50 = vpop.permute.xlu1 %226 }
 0x1d9   :  { %v230_v54 = vpop.permute.xlu0 %229  ;;  %v252_v57 = vrot.slane %v227_v50, %v719_v31 }
 0x1da   :  { %v256_v56 = vrot.slane %v230_v54, %v719_v31 }
 0x1dc   :  { %v233_v51 = vpop.permute.xlu1 %232  ;;  %v281_v62 = vsel %vm133_vm1, %v256_v56, %v252_v57 }
 0x1dd   :  { %v260_v58 = vrot.slane %v233_v51, %v719_v31 }
 0x1df   :  { %v282_v8 = vsel %vm135_vm2, %v260_v58, %v281_v62 }
 0x1e0   :  { %v236_v52 = vpop.permute.xlu1 %235 }
 0x1e1   :  { %v264_v59 = vrot.slane %v236_v52, %v719_v31 }
 0x1e3   :  { %v283_v12 = vsel %vm137_vm3, %v264_v59, %v282_v8 }
 0x1e4   :  { %v239_v53 = vpop.permute.xlu1 %238 }
 0x1e5   :  { %v268_v60 = vrot.slane %v239_v53, %v719_v31 }
 0x1e7   :  { %v284_v14 = vsel %vm139_vm4, %v268_v60, %v283_v12 }
 0x1e8   :  { %v242_v55 = vpop.permute.xlu1 %241 }
 0x1e9   :  { %v272_v7 = vrot.slane %v242_v55, %v719_v31 }
 0x1eb   :  { %v285_v16 = vsel %vm141_vm5, %v272_v7, %v284_v14 }
 0x1ec   :  { %v245_v61 = vpop.permute.xlu1 %244 }
 0x1ed   :  { %v276_v11 = vrot.slane %v245_v61, %v719_v31 }
 0x1ef   :  { %v286_v20 = vsel %vm143_vm6, %v276_v11, %v285_v16 }
 0x1f0   :  { %v248_v15 = vpop.permute.xlu1 %247 }
 0x1f1   :  { %v280_v19 = vrot.slane %v248_v15, %v719_v31 }
 0x1f3   :  { %v287_v21 = vsel %vm145_vm7, %v280_v19, %v286_v20 }
 0x1f4   :  { %v289_v23 = vsel %vm148_vm8, %v287_v21, 0.0 }
 0x1f5   :  { %290 = vadd.xlane.f32.xlu1 %v289_v23 }
 0x282   :  { %v291_v24 = vpop.xlane.xlu1 %290 }
 0x283   :  { %561 = vrcp.f32 %v291_v24 }
 0x28d   :  { %v562_v25 = vpop.eup %561 }
 0x28e   :  { %v293_v28 = vmul.f32 %v562_v25, %v291_v24 }
 0x290   :  { %v294_v29 = vsub.f32 2.0, %v293_v28 }
 0x292   :  { %v295_v30 = vmul.f32 %v562_v25, %v294_v29 }
 0x294   :  { %v300_v33 = vrot.slane %v295_v30, %v155_v63  ;;  %v304_v35 = vrot.slane %v295_v30, %v159_v0  ;;  %v308_v39 = vrot.slane %v295_v30, %v163_v3  ;;  %v312_v42 = vrot.slane %v295_v30, %v167_v4 }
 0x295   :  { %v316_v45 = vrot.slane %v295_v30, %v171_v13  ;;  %v320_v0 = vrot.slane %v295_v30, %v175_v22  ;;  %v324_v3 = vrot.slane %v295_v30, %v179_v26  ;;  %v328_v4 = vrot.slane %v295_v30, %v183_v32 }
 0x296   :  { %v337_v34 = vmul.f32 %v546_v36, %v300_v33  ;;  %v338_v38 = vmul.f32 %v548_v37, %v304_v35  ;;  %v339_v40 = vmul.f32 %v550_v41, %v308_v39  ;;  %v340_v43 = vmul.f32 %v552_v44, %v312_v42 }
 0x297   :  { %v341_v63 = vmul.f32 %v554_v46, %v316_v45  ;;  %v342_v36 = vmul.f32 %v556_v47, %v320_v0  ;;  %v343_v37 = vmul.f32 %v558_v48, %v324_v3  ;;  %v344_v41 = vmul.f32 %v560_v49, %v328_v4 }
 0x298   :  { %347 = vperm.xlu0 %544, %v337_v34  }
 0x29c   :  { %352 = vperm.xlu0 %544, %v338_v38  }
 0x2a0   :  { %357 = vperm.xlu0 %544, %v339_v40  }
 0x2a4   :  { %362 = vperm.xlu0 %544, %v340_v43  }
 0x2a8   :  { %367 = vperm.xlu0 %544, %v341_v63  }
 0x2ac   :  { %372 = vperm.xlu0 %544, %v342_v36  }
 0x2b0   :  { %377 = vperm.xlu0 %544, %v343_v37  }
 0x2b4   :  { %382 = vperm.xlu0 %544, %v344_v41  }
 0x317   :  { %v348_v44 = vpop.permute.xlu0 %347 }
 0x318   :  { %v385_v50 = vmul.f32 %v348_v44, %v681_v1  ;;  %v469_v7 = vrot.slane %v348_v44, %v719_v31 }
 0x31a   :  { %v393_v26 = vsel %vm57_vm0, %v385_v50, 0.0 }
 0x31b   :  { %v353_v13 = vpop.permute.xlu0 %352  ;;  %v394_v52 = vrot.slane %v393_v26, 4 }
 0x31c   :  { %v386_v46 = vmul.f32 %v353_v13, %v687_v5  ;;  %v473_v62 = vrot.slane %v353_v13, %v719_v31 }
 0x31e   :  { %v400_v51 = vsel %vm57_vm0, %v386_v46, 0.0  ;;  %v498_v24 = vsel %vm133_vm1, %v473_v62, %v469_v7 }
 0x31f   :  { %v358_v22 = vpop.permute.xlu0 %357  ;;  %v401_v49 = vrot.slane %v400_v51, 4 }
 0x320   :  { %v387_v47 = vmul.f32 %v358_v22, %v683_v2  ;;  %v395_v2 = vadd.f32 %v394_v52, %v393_v26  ;;  %v477_v11 = vrot.slane %v358_v22, %v719_v31 }
 0x321   :  { %v402_v56 = vadd.f32 %v401_v49, %v400_v51 }
 0x322   :  { %v407_v48 = vsel %vm57_vm0, %v387_v47, 0.0  ;;  %v396_v14 = vrot.slane %v395_v2, 2  ;;  %v499_v30 = vsel %vm135_vm2, %v477_v11, %v498_v24 }
 0x323   :  { %v363_v27 = vpop.permute.xlu0 %362  ;;  %v408_v53 = vrot.slane %v407_v48, 4  ;;  %v403_v8 = vrot.slane %v402_v56, 2 }
 0x324   :  { %v388_v32 = vmul.f32 %v363_v27, %v689_v6  ;;  %v481_v15 = vrot.slane %v363_v27, %v719_v31  ;;  %v397_v35 = vadd.f32 %v396_v14, %v395_v2 }
 0x325   :  { %v409_v57 = vadd.f32 %v408_v53, %v407_v48  ;;  %v404_v29 = vadd.f32 %v403_v8, %v402_v56 }
 0x326   :  { %v414_v54 = vsel %vm57_vm0, %v388_v32, 0.0  ;;  %v500_v39 = vsel %vm137_vm3, %v481_v15, %v499_v30  ;;  %v398_v47 = vrot.slane %v397_v35, 1 }
 0x327   :  { %v415_v5 = vrot.slane %v414_v54, 4  ;;  %v368_v55 = vpop.permute.xlu0 %367  ;;  %v405_v4 = vrot.slane %v404_v29, 1 }
 0x328   :  { %v389_v1 = vmul.f32 %v368_v55, %v693_v9  ;;  %v410_v9 = vrot.slane %v409_v57, 2  ;;  %v485_v20 = vrot.slane %v368_v55, %v719_v31 }
 0x329   :  { %v416_v59 = vadd.f32 %v415_v5, %v414_v54 }
 0x32a   :  { %v421_v58 = vsel %vm57_vm0, %v389_v1, 0.0  ;;  %v411_v38 = vadd.f32 %v410_v9, %v409_v57  ;;  %v501_v43 = vsel %vm139_vm4, %v485_v20, %v500_v39 }
 0x32b   :  { %v422_v60 = vrot.slane %v421_v58, 4  ;;  %v373_v61 = vpop.permute.xlu0 %372  ;;  %v417_v19 = vrot.slane %v416_v59, 2 }
 0x32c   :  { %v390_v6 = vmul.f32 %v373_v61, %v695_v10  ;;  %v489_v25 = vrot.slane %v373_v61, %v719_v31  ;;  %v412_v46 = vrot.slane %v411_v38, 1 }
 0x32d   :  { %v423_v12 = vadd.f32 %v422_v60, %v421_v58  ;;  %v418_v42 = vadd.f32 %v417_v19, %v416_v59 }
 0x32e   :  { %v428_v16 = vsel %vm57_vm0, %v390_v6, 0.0  ;;  %v502_v36 = vsel %vm141_vm5, %v489_v25, %v501_v43 }
 0x32f   :  { %v429_v21 = vrot.slane %v428_v16, 4  ;;  %v378_v23 = vpop.permute.xlu0 %377  ;;  %v424_v10 = vrot.slane %v423_v12, 2  ;;  %v419_v51 = vrot.slane %v418_v42, 1 }
 0x330   :  { %v391_v28 = vmul.f32 %v378_v23, %v703_v17  ;;  %v493_v34 = vrot.slane %v378_v23, %v719_v31 }
 0x331   :  { %v430_v33 = vadd.f32 %v429_v21, %v428_v16  ;;  %v425_v0 = vadd.f32 %v424_v10, %v423_v12 }
 0x332   :  { %v435_v40 = vsel %vm57_vm0, %v391_v28, 0.0  ;;  %v503_v13 = vsel %vm143_vm6, %v493_v34, %v502_v36 }
 0x333   :  { %v431_v45 = vrot.slane %v430_v33, 2  ;;  %v436_v63 = vrot.slane %v435_v40, 4  ;;  %v383_v17 = vpop.permute.xlu0 %382 }
 0x334   :  { %v392_v3 = vmul.f32 %v383_v17, %v705_v18  ;;  %v497_v37 = vrot.slane %v383_v17, %v719_v31  ;;  %v426_v18 = vrot.slane %v425_v0, 1 }
 0x335   :  { %v432_v41 = vadd.f32 %v431_v45, %v430_v33  ;;  %v437_v44 = vadd.f32 %v436_v63, %v435_v40 }
 0x336   :  { %v442_v50 = vsel %vm57_vm0, %v392_v3, 0.0  ;;  %v504_v22 = vsel %vm145_vm7, %v497_v37, %v503_v13 }
 0x337   :  { %v438_v26 = vrot.slane %v437_v44, 2  ;;  %v443_v48 = vrot.slane %v442_v50, 4  ;;  %506 = vst.msk [vmem:[#allocation7] sm:$0xff] %vm148_vm8, %v504_v22 }
 0x338   :  { %596 = shalt.err (!%p593_p12)
}
 0x339   :  { %s597_s9 = scalar_lea.hbm %s861_s4, 128 }
 0x33a   :  { %p598_p13 = scmp.ne.s32.totalorder %s861_s4, %s597_s9  ;;  %p601_p0 = scmp.lt.u32.totalorder %s597_s9, %s861_s4 }
 0x33c   :  { %p603_p1 = pnand %p601_p0, %p598_p13 }
 0x33e   :  { %606 = shalt.err (!%p603_p1)
}
 0x33f   :  { %526 = dma.vmem_to_hbm [thread:$0]  %s524_s5, 128, %s861_s4, [#allocation8]   ;;  %v406_v31 = vadd.f32 %v405_v4, %v404_v29  ;;  %v433_v27 = vrot.slane %v432_v41, 1  ;;  %v439_v32 = vadd.f32 %v438_v26, %v437_v44  ;;  %v444_v49 = vadd.f32 %v443_v48, %v442_v50 }
 0x340   :  { %v413_v52 = vadd.f32 %v412_v46, %v411_v38  ;;  %v399_v53 = vadd.f32 %v398_v47, %v397_v35  ;;  %v420_v54 = vadd.f32 %v419_v51, %v418_v42  ;;  %v427_v1 = vadd.f32 %v426_v18, %v425_v0  ;;  %s640_s4 = smov [#allocation6]  }
 0x341   :  { %v440_v5 = vrot.slane %v439_v32, 1  ;;  %v445_v55 = vrot.slane %v444_v49, 2  ;;  %v434_v2 = vadd.f32 %v433_v27, %v432_v41  ;;  %s513_s16 = sshll.u32 %s640_s4, 4  ;;  %s514_s16 = int_to_ptr.vmem [resolvable:$true] %s513_s16 }
 0x342   :  { %v457_v56 = vsel %vm133_vm1, %v406_v31, %v399_v53  ;;  %s607_s17 = scalar_lea.vmem %s514_s16, 128  ;;  %p612_p3 = scmp.lt.s32.totalorder %s514_s16, %s514_s16 }
 0x343   :  { %v446_v57 = vadd.f32 %v445_v55, %v444_v49  ;;  %v458_v58 = vsel %vm135_vm2, %v413_v52, %v457_v56  ;;  %v441_v59 = vadd.f32 %v440_v5, %v439_v32  ;;  %p608_p2 = scmp.ne.s32.totalorder %s514_s16, %s607_s17  ;;  %p613_p4 = scmp.lt.s32.totalorder %s607_s17, %s607_s17 }
 0x344   :  { %v459_v61 = vsel %vm137_vm3, %v420_v54, %v458_v58 }
 0x345   :  { %v447_v60 = vrot.slane %v446_v57, 1  ;;  %v460_v62 = vsel %vm139_vm4, %v427_v1, %v459_v61  ;;  %p614_p5 = por %p613_p4, %p612_p3 }
 0x346   :  { %v461_v7 = vsel %vm141_vm5, %v434_v2, %v460_v62 }
 0x347   :  { %v448_v6 = vadd.f32 %v447_v60, %v446_v57  ;;  %v462_v8 = vsel %vm143_vm6, %v441_v59, %v461_v7  ;;  %p615_p6 = pnand %p614_p5, %p608_p2 }
 0x349   :  { %v463_v11 = vsel %vm145_vm7, %v448_v6, %v462_v8 }
 0x34a   :  { %465 = vst.msk [vmem:[#allocation6] sm:$0xff] %vm57_vm0, %v463_v11 }
 0x34b   :  { %618 = shalt.err (!%p615_p6)
}
 0x34c   :  { %s619_s20 = scalar_lea.hbm %s860_s3, 128 }
 0x34d   :  { %p620_p7 = scmp.ne.s32.totalorder %s860_s3, %s619_s20  ;;  %p623_p8 = scmp.lt.u32.totalorder %s619_s20, %s860_s3 }
 0x34f   :  { %p625_p9 = pnand %p623_p8, %p620_p7 }
 0x351   :  { %628 = shalt.err (!%p625_p9)
}
 0x352   :  { %516 = dma.vmem_to_hbm [thread:$0]  %s514_s16, 128, %s860_s3, [#allocation5]  }
 0x353   :  { %631 = dma.done.wait [#allocation5], 128  }
 0x354   :  { %632 = vsyncadd [#allocation5], 4294967168 }
 0x355   :  { %633 = dma.done.wait [#allocation8], 128  }
 0x356   :  { %634 = vsyncadd [#allocation8], 4294967168 }
 0x357   :  { %533 = vsyncpa [#allocation4], 1 }
 0x358   :  { %534 = vsyncpa [#allocation5], 1 }
 0x359   :  { %535 = vsyncpa [#allocation8], 1 }

</bundles_post_ra>
